<compile_context>
chip_gen: v5e
topology: v5e:2x2
jax: 0.10.0
libtpu: 0.0.40
codegen_flags: <defaults>
</compile_context>

<pallas_src>
import functools

import jax
import jax.numpy as jnp
from jax.experimental import pallas as pl
from jax.experimental.pallas import tpu as pltpu


def _focal_loss_kernel(x_ref, t_ref, out_ref, *, alpha, gamma, n_rows):
    x = x_ref[...].astype(jnp.float32)            # (tile_n, C) logits
    t = t_ref[...]                                # (tile_n, 1) int32 targets

    # -- softmax over classes (F.softmax(inputs, dim=-1)) -------------------
    m1 = jnp.max(x, axis=-1, keepdims=True)
    e1 = jnp.exp(x - m1)
    s = e1 * pl.reciprocal(jnp.sum(e1, axis=-1, keepdims=True), approx=False)

    # -- cross_entropy applies log_softmax again (the "double softmax") -----
    # s is in (0, 1], so exp(s) cannot overflow: no second stabilization.
    sum_e2 = jnp.sum(jnp.exp(s), axis=-1, keepdims=True)     # (tile_n, 1)

    col = jax.lax.broadcasted_iota(jnp.int32, x.shape, 1)
    # Target prob of the (first) softmax, gathered without a f32 one-hot temp.
    s_t = jnp.sum(jnp.where(col == t, s, 0.0), axis=-1, keepdims=True)

    ce = jnp.log(sum_e2) - s_t                    # -log_softmax(s)[target]
    pt = jnp.exp(-ce)                             # exact, (tile_n,1) EUP work

    one_minus_pt = 1.0 - pt
    ig = int(gamma)
    if float(gamma) == float(ig) and 0 <= ig <= 8:
        w = jnp.ones_like(one_minus_pt)
        for _ in range(ig):                       # VALU multiplies, no pow
            w = w * one_minus_pt
    else:
        w = jnp.maximum(one_minus_pt, 0.0) ** gamma   # clamp avoids pow(neg) NaN
    focal = alpha * w * ce                        # (tile_n, 1)

    # Mask rows past the true batch size (partial last tile). jnp.where does
    # not propagate NaN/Inf from the unselected (garbage-padded) rows.
    base = pl.program_id(0) * x.shape[0]
    row = base + jax.lax.broadcasted_iota(jnp.int32, (x.shape[0], 1), 0)
    psum = jnp.sum(jnp.where(row < n_rows, focal, 0.0))

    # Lane-dense (8,128) partial-sum block: value at [0,0], zeros elsewhere.
    r = jax.lax.broadcasted_iota(jnp.int32, (8, 128), 0)
    c = jax.lax.broadcasted_iota(jnp.int32, (8, 128), 1)
    out_ref[...] = jnp.where((r == 0) & (c == 0), psum, 0.0)


def _device_kind():
    try:
        return jax.devices()[0].device_kind.lower()
    except Exception:
        return ""


def _vmem_capacity_bytes():
    # Generation-aware physical VMEM (v5e/v6e: 128 MiB, v7x: 64 MiB per TC).
    try:
        cap = int(pltpu.get_tpu_info().vmem_capacity_bytes)
        if cap > 0:
            return cap
    except Exception:
        pass
    kind = _device_kind()
    if "v5" in kind or "v6" in kind:
        return 128 << 20
    return 64 << 20  # conservative default (v7x per-TensorCore VMEM)


def _dimension_semantics():
    # Only core_parallel-style semantics actually split a grid axis across the
    # two TensorCores of a v7x chip; plain "parallel" elsewhere.
    kind = _device_kind()
    if "v7" in kind or "7x" in kind:
        try:
            return (pltpu.CORE_PARALLEL,)
        except AttributeError:
            pass
    return ("parallel",)


def _choose_tile_n(n, c, in_itemsize, tile_budget_bytes):
    # Per-row VMEM footprint of one pipelined grid step:
    #   logits block, double-buffered:                       2 * C * itemsize
    #   targets (tile_n,1) int32 padded to 128 lanes, x2:    2 * 512
    #   f32 (tile_n,C) temps (x cast, e1, s, masked-s):      4 * C * 4
    #   f32 (tile_n,1) temps padded to 128 lanes (m/sum/ce): 4 * 512
    per_row = 2 * c * in_itemsize + 2 * 512 + 4 * c * 4 + 4 * 512
    rows = tile_budget_bytes // per_row
    rows = max(8, (rows // 8) * 8)
    n8 = ((n + 7) // 8) * 8
    return int(min(rows, n8))


def focal_loss(inputs, targets, alpha=1.0, gamma=2.0):
    """inputs: (N, C) float32/bfloat16 logits; targets: (N,) int class indices."""
    n, c = inputs.shape
    in_itemsize = jnp.dtype(inputs.dtype).itemsize

    vmem_cap = _vmem_capacity_bytes()
    vmem_limit = int(min(int(vmem_cap * 0.75), 96 << 20))   # 48 MiB v7x, 96 MiB v5e/v6e
    tile_n = _choose_tile_n(n, c, in_itemsize, int(vmem_limit * 0.55))
    num_tiles = pl.cdiv(n, tile_n)

    t2d = targets.reshape(n, 1).astype(jnp.int32)

    kernel = functools.partial(
        _focal_loss_kernel, alpha=float(alpha), gamma=float(gamma), n_rows=n)

    cost = pl.CostEstimate(
        flops=10 * n * c,
        transcendentals=2 * n * c + 3 * n,
        bytes_accessed=n * c * in_itemsize + n * 4 + num_tiles * 8 * 128 * 4)

    partials = pl.pallas_call(
        kernel,
        out_shape=jax.ShapeDtypeStruct((8 * num_tiles, 128), jnp.float32),
        grid=(num_tiles,),
        in_specs=[
            pl.BlockSpec((tile_n, c), lambda i: (i, 0)),
            pl.BlockSpec((tile_n, 1), lambda i: (i, 0)),
        ],
        out_specs=pl.BlockSpec((8, 128), lambda i: (i, 0)),
        compiler_params=pltpu.CompilerParams(
            dimension_semantics=_dimension_semantics(),
            vmem_limit_bytes=vmem_limit),
        cost_estimate=cost,
    )(inputs, t2d)

    # Tiny final reduction in the wrapper (mean over the true N rows).
    return jnp.sum(partials) / jnp.float32(n)


def _reference_focal_loss(inputs, targets, alpha=1.0, gamma=2.0):
    # Pure-JAX reference mirroring the PyTorch module exactly.
    s = jax.nn.softmax(inputs.astype(jnp.float32), axis=-1)
    log_probs = jax.nn.log_softmax(s, axis=-1)
    ce = -jnp.take_along_axis(log_probs, targets[:, None], axis=-1)[:, 0]
    pt = jnp.exp(-ce)
    return jnp.mean(alpha * (1.0 - pt) ** gamma * ce)


if __name__ == "__main__":
    key = jax.random.PRNGKey(0)
    kx, kt, kx2, kt2 = jax.random.split(key, 4)

    # Small batch of logits over 16 classes.
    N, C = 8, 16
    x = jax.random.normal(kx, (N, C), dtype=jnp.float32)
    targets = jax.random.randint(kt, (N,), 0, C, dtype=jnp.int32)

    loss = focal_loss(x, targets, alpha=1.0, gamma=2.0)
    jax.block_until_ready(loss)
    ref = _reference_focal_loss(x, targets, alpha=1.0, gamma=2.0)
    assert jnp.allclose(loss, ref, atol=1e-4, rtol=1e-4), (loss, ref)

    # Second check: N not a multiple of 8 (exercises the masked partial tile),
    # non-default alpha/gamma.
    N2, C2 = 50, 10
    x2 = jax.random.normal(kx2, (N2, C2), dtype=jnp.float32)
    t2 = jax.random.randint(kt2, (N2,), 0, C2, dtype=jnp.int32)
    loss2 = focal_loss(x2, t2, alpha=0.25, gamma=3.0)
    jax.block_until_ready(loss2)
    ref2 = _reference_focal_loss(x2, t2, alpha=0.25, gamma=3.0)
    assert jnp.allclose(loss2, ref2, atol=1e-4, rtol=1e-4), (loss2, ref2)

    print("KERNEL_OK")
</pallas_src>

<mosaic_0001>
module attributes {stable_mosaic.version = 11 : i64} {
  func.func @_focal_loss_kernel(%arg0: i32, %arg1: memref<8x16xf32, #tpu.memory_space<vmem>>, %arg2: memref<8x1xi32, #tpu.memory_space<vmem>>, %arg3: memref<8x128xf32, #tpu.memory_space<vmem>>) attributes {dimension_semantics = [#tpu.dimension_semantics<parallel>], iteration_bounds = array<i64: 1>, scalar_prefetch = 0 : i64, scratch_operands = 0 : i64, tpu.core_type = #tpu.core_type<tc>, window_params = [{transform_indices = @transform_0, window_bounds = array<i64: 8, 16>}, {transform_indices = @transform_1, window_bounds = array<i64: 8, 1>}, {transform_indices = @transform_2, window_bounds = array<i64: 8, 128>}]} {
    %c0 = arith.constant 0 : index
    %c0_0 = arith.constant 0 : index
    %0 = vector.load %arg1[%c0, %c0_0] : memref<8x16xf32, #tpu.memory_space<vmem>>, vector<8x16xf32>
    %c0_1 = arith.constant 0 : index
    %c0_2 = arith.constant 0 : index
    %1 = vector.load %arg2[%c0_1, %c0_2] : memref<8x1xi32, #tpu.memory_space<vmem>>, vector<8x1xi32>
    %cst = arith.constant dense<0xFF800000> : vector<8xf32>
    %2 = vector.multi_reduction <maximumf>, %0, %cst [1] : vector<8x16xf32> to vector<8xf32>
    %3 = vector.shape_cast %2 : vector<8xf32> to vector<8x1xf32>
    %4 = vector.broadcast %3 : vector<8x1xf32> to vector<8x16xf32>
    %5 = arith.subf %0, %4 : vector<8x16xf32>
    %6 = math.exp %5 : vector<8x16xf32>
    %cst_3 = arith.constant dense<0.000000e+00> : vector<8xf32>
    %7 = vector.multi_reduction <add>, %6, %cst_3 [1] : vector<8x16xf32> to vector<8xf32>
    %8 = vector.shape_cast %7 : vector<8xf32> to vector<8x1xf32>
    %9 = tpu.reciprocal %8 : vector<8x1xf32> -> vector<8x1xf32>
    %10 = vector.broadcast %9 : vector<8x1xf32> to vector<8x16xf32>
    %11 = arith.mulf %6, %10 : vector<8x16xf32>
    %12 = math.exp %11 : vector<8x16xf32>
    %cst_4 = arith.constant dense<0.000000e+00> : vector<8xf32>
    %13 = vector.multi_reduction <add>, %12, %cst_4 [1] : vector<8x16xf32> to vector<8xf32>
    %14 = vector.shape_cast %13 : vector<8xf32> to vector<8x1xf32>
    %15 = tpu.iota {dimensions = array<i32: 1>} : vector<8x16xi32>
    %16 = vector.broadcast %1 : vector<8x1xi32> to vector<8x16xi32>
    %17 = arith.cmpi eq, %15, %16 : vector<8x16xi32>
    %cst_5 = arith.constant 0.000000e+00 : f32
    %18 = vector.broadcast %cst_5 : f32 to vector<8x16xf32>
    %19 = arith.select %17, %11, %18 : vector<8x16xi1>, vector<8x16xf32>
    %cst_6 = arith.constant dense<0.000000e+00> : vector<8xf32>
    %20 = vector.multi_reduction <add>, %19, %cst_6 [1] : vector<8x16xf32> to vector<8xf32>
    %21 = vector.shape_cast %20 : vector<8xf32> to vector<8x1xf32>
    %22 = math.log %14 : vector<8x1xf32>
    %23 = arith.subf %22, %21 : vector<8x1xf32>
    %cst_7 = arith.constant 0.000000e+00 : f32
    %24 = vector.broadcast %cst_7 : f32 to vector<8x1xf32>
    %25 = arith.subf %24, %23 : vector<8x1xf32>
    %26 = math.exp %25 : vector<8x1xf32>
    %cst_8 = arith.constant 1.000000e+00 : f32
    %27 = vector.broadcast %cst_8 : f32 to vector<8x1xf32>
    %28 = arith.subf %27, %26 : vector<8x1xf32>
    %cst_9 = arith.constant 1.000000e+00 : f32
    %29 = vector.broadcast %cst_9 : f32 to vector<8x1xf32>
    %30 = arith.mulf %29, %28 : vector<8x1xf32>
    %31 = arith.mulf %30, %28 : vector<8x1xf32>
    %cst_10 = arith.constant 1.000000e+00 : f32
    %32 = vector.broadcast %cst_10 : f32 to vector<8x1xf32>
    %33 = arith.mulf %32, %31 : vector<8x1xf32>
    %34 = arith.mulf %33, %23 : vector<8x1xf32>
    %c8_i32 = arith.constant 8 : i32
    %35 = arith.muli %arg0, %c8_i32 : i32
    %36 = tpu.iota {dimensions = array<i32: 0>} : vector<8x1xi32>
    %37 = vector.broadcast %35 : i32 to vector<8x1xi32>
    %38 = arith.addi %37, %36 : vector<8x1xi32>
    %c8_i32_11 = arith.constant 8 : i32
    %39 = vector.broadcast %c8_i32_11 : i32 to vector<8x1xi32>
    %40 = arith.cmpi slt, %38, %39 : vector<8x1xi32>
    %cst_12 = arith.constant 0.000000e+00 : f32
    %41 = vector.broadcast %cst_12 : f32 to vector<8x1xf32>
    %42 = arith.select %40, %34, %41 : vector<8x1xi1>, vector<8x1xf32>
    %43 = vector.shape_cast %42 : vector<8x1xf32> to vector<1x8x1xf32>
    %cst_13 = arith.constant dense<0.000000e+00> : vector<1xf32>
    %44 = vector.multi_reduction <add>, %43, %cst_13 [1, 2] : vector<1x8x1xf32> to vector<1xf32>
    %45 = vector.shape_cast %44 : vector<1xf32> to vector<1x1x1xf32>
    %46 = vector.extract %45[0, 0, 0] : f32 from vector<1x1x1xf32>
    %47 = tpu.iota {dimensions = array<i32: 0>} : vector<8x128xi32>
    %48 = tpu.iota {dimensions = array<i32: 1>} : vector<8x128xi32>
    %c0_i32 = arith.constant 0 : i32
    %49 = vector.broadcast %c0_i32 : i32 to vector<8x128xi32>
    %50 = arith.cmpi eq, %47, %49 : vector<8x128xi32>
    %c0_i32_14 = arith.constant 0 : i32
    %51 = vector.broadcast %c0_i32_14 : i32 to vector<8x128xi32>
    %52 = arith.cmpi eq, %48, %51 : vector<8x128xi32>
    %53 = arith.andi %50, %52 : vector<8x128xi1>
    %cst_15 = arith.constant 0.000000e+00 : f32
    %54 = vector.broadcast %46 : f32 to vector<8x128xf32>
    %55 = vector.broadcast %cst_15 : f32 to vector<8x128xf32>
    %56 = arith.select %53, %54, %55 : vector<8x128xi1>, vector<8x128xf32>
    %c0_16 = arith.constant 0 : index
    %c0_17 = arith.constant 0 : index
    %57 = vector.load %arg3[%c0_16, %c0_17] : memref<8x128xf32, #tpu.memory_space<vmem>>, vector<8x128xf32>
    tpu.vector_store %arg3[%c0_16, %c0_17], %56 {strides = array<i32>} : memref<8x128xf32, #tpu.memory_space<vmem>>, vector<8x128xf32>,
    return
  }
  func.func @transform_0(%arg0: i32) -> (i32, i32) {
    %c0_i32 = arith.constant 0 : i32
    %c0_i32_0 = arith.constant 0 : i32
    return %arg0, %c0_i32 : i32, i32
  }
  func.func @transform_1(%arg0: i32) -> (i32, i32) {
    %c0_i32 = arith.constant 0 : i32
    %c0_i32_0 = arith.constant 0 : i32
    return %arg0, %c0_i32 : i32, i32
  }
  func.func @transform_2(%arg0: i32) -> (i32, i32) {
    %c0_i32 = arith.constant 0 : i32
    %c0_i32_0 = arith.constant 0 : i32
    return %arg0, %c0_i32 : i32, i32
  }
}

</mosaic_0001>

<bundles_post_ra>
// kernel: tpu_custom_call.1
= control target key start
LH: loop header
LB: loop body
LE: loop exit
PB: predicated region body
PF: predicated region fallthrough
CT: control target
= control target key end

     0   :  { %vm14_vm0 = vcmask 130048   ;;  %s175_s0 = inlined_call_operand.vmem [shape: f32[8,16], index: 0, kind: input, shape index: {}]   ;;  %s176_s1 = inlined_call_operand.vmem [shape: s32[8,1], index: 1, kind: input, shape index: {}]   ;;  %s177_s2 = inlined_call_operand.hbm [shape: f32[8,128], index: 2, kind: output, shape index: {}]  }
   0x1   :  { %v12_v0 = vld [vmem:[%s175_s0] sm:$0xff] }
   0x2   :  { %7 = vsyncpa [#allocation3], 0  ;;  %v15_v1 = vsel %vm14_vm0, %v12_v0, -inf  ;;  %v13_v2 = vld [vmem:[%s176_s1] sm:$0xff]  ;;  %v145_v3 = vmov 0   ;;  %v44_v12 = vlaneseq  ;;  %vm70_vm6 = vcmask 7168  }
   0x3   :  { %16 = vmax.xlane.f32.xlu0 %v15_v1  ;;  %107 = vset.pattern.permute.xlu1 %v145_v3  ;;  %s146_s0 = smov [#allocation2]   ;;  %s94_s15 = sshll.u32 %s177_s2, 4  ;;  %s95_s15 = int_to_ptr.hbm [resolvable:$true] %s94_s15 }
   0x4   :  { %108 = vset.pattern.permute.xlu0 %v145_v3  ;;  %47 = vperm.xlu1 %107, %v13_v2   ;;  %v45_v17 = vand.u32 127, %v44_v12  ;;  %v65_v48 = vshrl.u32 %v44_v12, 7  ;;  %s92_s1 = sshll.u32 %s146_s0, 4  ;;  %s93_s1 = int_to_ptr.vmem [resolvable:$true] %s92_s1 }
   0x6   :  { %vm81_vm7 = vcmp.eq.s32.totalorder %v65_v48, 0  ;;  %vm82_vm8 = vcmp.eq.s32.totalorder %v45_v17, 0 }
   0x7   :  { %vm83_vm9 = vmand %vm81_vm7, %vm82_vm8 }
  0x76   :  { %v17_v4 = vpop.xlane.xlu0 %16  ;;  %v48_v19 = vpop.permute.xlu1 %47 }
  0x77   :  { %v18_v5 = vsub.f32 %v12_v0, %v17_v4  ;;  %vm49_vm5 = vcmp.eq.s32.totalorder %v45_v17, %v48_v19 }
  0x79   :  { %v19_v6 = vmul.f32 1.442695, %v18_v5 }
  0x7b   :  { %109 = vpow2.f32 %v19_v6 }
  0x81   :  { %v110_v7 = vpop.eup %109 }
  0x82   :  { %v21_v8 = vsel %vm14_vm0, %v110_v7, 0.0 }
  0x83   :  { %22 = vadd.xlane.f32.xlu0 %v21_v8 }
  0xf6   :  { %v23_v9 = vpop.xlane.xlu0 %22 }
  0xf7   :  { %111 = vrcp.f32 %v23_v9  ;;  %v35_v14 = vand.u32 2147483648, %v23_v9  ;;  %v33_v16 = vand.u32 2147483647, %v23_v9  ;;  %vm29_vm2 = vweird.f32 %v23_v9 }
  0xf9   :  { %v36_v20 = vor.u32 1.1754944e-38, %v35_v14  ;;  %vm34_vm4 = vcmp.eq.f32.partialorder %v33_v16, 8.507059e+37 }
  0xfd   :  { %v112_v10 = vpop.eup %111 }
  0xfe   :  { %v25_v11 = vmul.f32 %v112_v10, %v23_v9  ;;  %vm30_vm1 = vweird.f32 %v112_v10 }
  0xff   :  { %vm31_vm3 = vmor %vm29_vm2, %vm30_vm1 }
 0x100   :  { %v26_v13 = vsub.f32 1.0, %v25_v11 }
 0x102   :  { %v27_v15 = vmul.f32 %v112_v10, %v26_v13 }
 0x104   :  { %v28_v18 = vadd.f32 %v112_v10, %v27_v15 }
 0x106   :  { %v32_v21 = vsel %vm31_vm3, %v112_v10, %v28_v18 }
 0x107   :  { %v37_v22 = vsel %vm34_vm4, %v36_v20, %v32_v21 }
 0x108   :  { %v38_v23 = vmul.f32 %v110_v7, %v37_v22 }
 0x10a   :  { %v50_v24 = vsel %vm49_vm5, %v38_v23, 0.0  ;;  %v39_v25 = vmul.f32 1.442695, %v38_v23 }
 0x10b   :  { %v51_v26 = vsel %vm14_vm0, %v50_v24, 0.0 }
 0x10c   :  { %52 = vadd.xlane.f32.xlu2 %v51_v26  ;;  %113 = vpow2.f32 %v39_v25 }
 0x112   :  { %v114_v27 = vpop.eup %113 }
 0x113   :  { %v41_v28 = vsel %vm14_vm0, %v114_v27, 0.0 }
 0x114   :  { %42 = vadd.xlane.f32.xlu1 %v41_v28 }
 0x17f   :  { %v53_v32 = vpop.xlane.xlu2 %52 }
 0x187   :  { %v43_v29 = vpop.xlane.xlu1 %42 }
 0x188   :  { %115 = vlog2.f32 %v43_v29 }
 0x18e   :  { %v116_v30 = vpop.eup %115 }
 0x18f   :  { %v55_v31 = vmul.f32 0.6931472, %v116_v30 }
 0x191   :  { %v56_v33 = vsub.f32 %v55_v31, %v53_v32 }
 0x193   :  { %v57_v34 = vsub.f32 0.0, %v56_v33 }
 0x195   :  { %v58_v35 = vmul.f32 1.442695, %v57_v34 }
 0x197   :  { %117 = vpow2.f32 %v58_v35 }
 0x19d   :  { %v118_v36 = vpop.eup %117 }
 0x19e   :  { %v60_v37 = vsub.f32 1.0, %v118_v36 }
 0x1a0   :  { %v61_v38 = vmul.f32 %v60_v37, %v60_v37 }
 0x1a2   :  { %v62_v39 = vmul.f32 %v61_v38, %v56_v33 }
 0x1a4   :  { %v71_v40 = vsel %vm70_vm6, %v62_v39, 0.0 }
 0x1a5   :  { %72 = vadd.xlane.f32.xlu2 %v71_v40 }
 0x218   :  { %v73_v41 = vpop.xlane.xlu2 %72 }
 0x219   :  { %v74_v42 = vrot.slane %v73_v41, 4 }
 0x21b   :  { %v75_v43 = vadd.f32 %v74_v42, %v73_v41 }
 0x21d   :  { %v76_v44 = vrot.slane %v75_v43, 2 }
 0x21f   :  { %v77_v45 = vadd.f32 %v76_v44, %v75_v43 }
 0x221   :  { %v78_v46 = vrot.slane %v77_v45, 1 }
 0x223   :  { %v79_v47 = vadd.f32 %v78_v46, %v77_v45 }
 0x225   :  { %103 = vpush %v79_v47 }
 0x256   :  { %s104_s16 = spop %103 }
 0x257   :  { %v84_v49 = vstv %s104_s16 }
 0x258   :  { %v85_v50 = vsel %vm83_vm9, %v84_v49, 0.0 }
 0x259   :  { %86 = vst [vmem:[#allocation2] sm:$0xff] %v85_v50 }
 0x25a   :  { %97 = dma.vmem_to_hbm [thread:$0]  %s93_s1, 128, %s95_s15, [#allocation3]  }
 0x25b   :  { %143 = dma.done.wait [#allocation3], 128  }
 0x25c   :  { %144 = vsyncadd [#allocation3], 4294967168 }
 0x25d   :  { %102 = vsyncpa [#allocation3], 1 }

</bundles_post_ra>
